<compile_context>
chip_gen: v5e
topology: v5e:2x2
jax: 0.10.0
libtpu: 0.0.40
codegen_flags: <defaults>
</compile_context>

<pallas_src>
import functools

import jax
import jax.numpy as jnp
import numpy as np
from jax.experimental import pallas as pl
from jax.experimental.pallas import tpu as pltpu

NUM_CLUSTER = 30
REGULARIZER = 0.01


def _round_up(x, m):
    return ((x + m - 1) // m) * m


# ----------------------- kernel 1: conv1 (fused with @W2) -----------------------
def _conv1_kernel(a_ref, x_ref, w1_ref, b1_ref, w2_ref, g_ref):
    # conv1 on one row tile of A:  H = relu(A_tile @ (X @ W1) + b1)
    # X @ W1 is tiny (N x F x HIDP) and recomputed per tile to keep it in-kernel.
    xw1 = jnp.dot(x_ref[...], w1_ref[...], preferred_element_type=jnp.float32)
    h = jnp.dot(a_ref[...], xw1.astype(jnp.bfloat16),          # bf16 x bf16 on MXU
                preferred_element_type=jnp.float32)
    h = jnp.maximum(h + b1_ref[...], 0.0)
    # dropout(p=0) is the identity.
    # Fuse the row-wise H @ W2 so kernel 2 only needs the N^2-scale A @ G matmul.
    g = jnp.dot(h, w2_ref[...], preferred_element_type=jnp.float32)
    g_ref[...] = g.astype(jnp.bfloat16)


# -------------------- kernel 2: conv2 + softmax (lane-dense) --------------------
def _conv2_softmax_kernel(a_ref, g_ref, b2_ref, fx_ref):
    z = jnp.dot(a_ref[...], g_ref[...],                        # bf16 x bf16 on MXU
                preferred_element_type=jnp.float32)
    z = z + b2_ref[...]
    # Mask padded cluster columns so they contribute exactly 0 after the softmax.
    col = jax.lax.broadcasted_iota(jnp.int32, z.shape, 1)
    z = jnp.where(col < NUM_CLUSTER, z, -1e30)
    m = jnp.max(z, axis=-1, keepdims=True)
    e = jnp.exp(z - m)
    s = jnp.sum(e, axis=-1, keepdims=True)
    fx_ref[...] = e * pl.reciprocal(s, approx=True)


# ---------------- kernel 3: edge MSE (SMEM gather) + regularizer ----------------
def _edge_loss_kernel(src_ref, dst_ref, fx_ref, ea_ref, loss_ref,
                      *, n_nodes, n_edges):
    # True gather: per-edge dynamic row slices of FX with indices held in SMEM.
    loss_ref[...] = jnp.zeros_like(loss_ref)

    @pl.loop(0, n_edges)
    def _(e):
        s = src_ref[e]
        d = dst_ref[e]
        fs = fx_ref[pl.ds(s, 1), :]                            # (1, CP)
        fd = fx_ref[pl.ds(d, 1), :]
        ff = jnp.sum(fs * fd, keepdims=True)                   # (1, 1)
        diff = ff - ea_ref[e]
        loss_ref[...] += diff * diff

    mse = loss_ref[...] * (1.0 / n_edges)                      # (1, 1)

    # pregularize = -sum_c log(1.0001 - exp(sum_n log(1 - FX^2)))
    fx = fx_ref[...]                                           # (N_pad, CP)
    rmask = jax.lax.broadcasted_iota(jnp.int32, fx.shape, 0) < n_nodes
    # (log1p(-fx*fx) would be safer near FX -> 1; kept as log(1-x) to match ref.)
    nfx = jnp.where(rmask, jnp.log(1.0 - fx * fx), 0.0)        # padded rows/cols -> 0
    colsum = jnp.sum(nfx, axis=0, keepdims=True)               # (1, CP)
    cmask = jax.lax.broadcasted_iota(jnp.int32, colsum.shape, 1) < NUM_CLUSTER
    term = jnp.where(cmask, jnp.log(1.0001 - jnp.exp(colsum)), 0.0)
    preg = -jnp.sum(term, keepdims=True)                       # (1, 1)

    loss_ref[...] = mse + REGULARIZER * preg


def _build_norm_adj(edge_index, edge_attr, num_nodes, size):
    """Dense GCN-normalized adjacency (self-loops w=1), zero-padded to `size`."""
    src, dst = edge_index[0], edge_index[1]
    loop = jnp.arange(num_nodes, dtype=edge_index.dtype)
    src_all = jnp.concatenate([src, loop])
    dst_all = jnp.concatenate([dst, loop])
    w_all = jnp.concatenate([edge_attr.astype(jnp.float32),
                             jnp.ones((num_nodes,), jnp.float32)])
    deg = jnp.zeros((num_nodes,), jnp.float32).at[dst_all].add(w_all)
    dinv = jnp.where(deg > 0, jax.lax.rsqrt(deg), 0.0)
    norm = dinv[src_all] * w_all * dinv[dst_all]
    a = jnp.zeros((size, size), jnp.float32).at[dst_all, src_all].add(norm)
    return a


def gcn_edge2cluster(X, edge_index, edge_attr, W1, b1, W2, b2):
    N, F_in = X.shape
    E = edge_index.shape[1]
    HID = W1.shape[1]
    C = W2.shape[1]

    # ----- padded / tiled sizes -----
    n_pad = _round_up(max(N, 16), 16)
    tm = 16 if n_pad <= 256 else 128          # A row tile (multiple of 16 for bf16)
    n_pad = _round_up(n_pad, tm)
    hidp = _round_up(HID, 128)
    cp = _round_up(C, 128)                    # lane-dense cluster dim
    nb = n_pad // tm

    # ----- glue: dense bf16 adjacency + zero-padded params (plain JAX) -----
    # TODO(synk): for large sparse graphs, skip the dense O(N^2) adjacency and do the
    # SpMM by streaming (dst, src, norm) triplets / A row tiles from HBM instead.
    a_bf16 = _build_norm_adj(edge_index, edge_attr, N, n_pad).astype(jnp.bfloat16)
    x_pad = jnp.zeros((n_pad, F_in), jnp.float32).at[:N].set(X.astype(jnp.float32))
    w1p = jnp.zeros((F_in, hidp), jnp.float32).at[:, :HID].set(W1)
    b1p = jnp.zeros((1, hidp), jnp.float32).at[:, :HID].set(jnp.reshape(b1, (1, HID)))
    w2p = jnp.zeros((hidp, cp), jnp.float32).at[:HID, :C].set(W2)
    b2p = jnp.zeros((1, cp), jnp.float32).at[:, :C].set(jnp.reshape(b2, (1, C)))

    parallel = pltpu.CompilerParams(dimension_semantics=("parallel",))

    # ----- kernel 1: G = relu(A @ (X W1) + b1) @ W2, tiled over A row blocks -----
    g = pl.pallas_call(
        _conv1_kernel,
        out_shape=jax.ShapeDtypeStruct((n_pad, cp), jnp.bfloat16),
        grid=(nb,),
        in_specs=[
            pl.BlockSpec((tm, n_pad), lambda i: (i, 0)),    # A row tile (streamed)
            pl.BlockSpec((n_pad, F_in), lambda i: (0, 0)),  # X (resident)
            pl.BlockSpec((F_in, hidp), lambda i: (0, 0)),   # W1
            pl.BlockSpec((1, hidp), lambda i: (0, 0)),      # b1
            pl.BlockSpec((hidp, cp), lambda i: (0, 0)),     # W2
        ],
        out_specs=pl.BlockSpec((tm, cp), lambda i: (i, 0)),
        compiler_params=parallel,
    )(a_bf16, x_pad, w1p, b1p, w2p)

    # ----- kernel 2: FX = softmax(A @ G + b2), tiled over A row blocks -----
    fx_pad = pl.pallas_call(
        _conv2_softmax_kernel,
        out_shape=jax.ShapeDtypeStruct((n_pad, cp), jnp.float32),
        grid=(nb,),
        in_specs=[
            pl.BlockSpec((tm, n_pad), lambda i: (i, 0)),    # A row tile (streamed)
            pl.BlockSpec((n_pad, cp), lambda i: (0, 0)),    # G (resident)
            pl.BlockSpec((1, cp), lambda i: (0, 0)),        # b2
        ],
        out_specs=pl.BlockSpec((tm, cp), lambda i: (i, 0)),
        compiler_params=parallel,
    )(a_bf16, g, b2p)

    # ----- kernel 3: edge MSE via SMEM-indexed gather + cluster regularizer -----
    loss = pl.pallas_call(
        functools.partial(_edge_loss_kernel, n_nodes=N, n_edges=E),
        out_shape=jax.ShapeDtypeStruct((1, 1), jnp.float32),
        grid_spec=pltpu.PrefetchScalarGridSpec(
            num_scalar_prefetch=2,                           # src, dst -> SMEM
            grid=(1,),
            in_specs=[
                pl.BlockSpec(memory_space=pltpu.MemorySpace.VMEM),   # FX (full)
                pl.BlockSpec(memory_space=pltpu.MemorySpace.SMEM),   # edge_attr
            ],
            out_specs=pl.BlockSpec(memory_space=pltpu.MemorySpace.VMEM),
        ),
        compiler_params=pltpu.CompilerParams(dimension_semantics=("arbitrary",)),
    )(edge_index[0].astype(jnp.int32), edge_index[1].astype(jnp.int32),
      fx_pad, edge_attr.astype(jnp.float32))

    return fx_pad[:N, :C], loss[0, 0]


def reference(X, edge_index, edge_attr, W1, b1, W2, b2):
    """Pure-JAX reference mirroring the PyTorch / PyG semantics (scatter form)."""
    N = X.shape[0]
    src, dst = edge_index[0], edge_index[1]
    loop = jnp.arange(N, dtype=edge_index.dtype)
    src_all = jnp.concatenate([src, loop])
    dst_all = jnp.concatenate([dst, loop])
    w_all = jnp.concatenate([edge_attr, jnp.ones((N,), jnp.float32)])
    deg = jnp.zeros((N,), jnp.float32).at[dst_all].add(w_all)
    dinv = jnp.where(deg > 0, 1.0 / jnp.sqrt(deg), 0.0)
    norm = dinv[src_all] * w_all * dinv[dst_all]

    def conv(h, W, b):
        msg = (h @ W)[src_all] * norm[:, None]
        out = jnp.zeros((N, W.shape[1]), jnp.float32).at[dst_all].add(msg)
        return out + b

    H = jax.nn.relu(conv(X, W1, b1))
    Z = conv(H, W2, b2)
    FX = jax.nn.softmax(Z, axis=-1)
    FF = jnp.sum(FX[src] * FX[dst], axis=-1)
    NFX = jnp.log(1.0 - FX ** 2)
    preg = -jnp.sum(jnp.log(1.0001 - jnp.exp(jnp.sum(NFX, axis=0))))
    loss = jnp.mean((FF - edge_attr) ** 2)
    return FX, loss + REGULARIZER * preg


if __name__ == "__main__":
    N, F_IN, E, HID = 48, 8, 96, 64

    key = jax.random.PRNGKey(0)
    kx, ke, kw, kw1, kw2 = jax.random.split(key, 5)

    # graph data (no self-loops in the random edge list)
    X = jax.random.normal(kx, (N, F_IN), dtype=jnp.float32)
    src = jax.random.randint(ke, (E,), 0, N, dtype=jnp.int32)
    off = jax.random.randint(kw, (E,), 1, N, dtype=jnp.int32)
    dst = (src + off) % N
    edge_index = jnp.stack([src, dst], axis=0)
    edge_attr = jax.random.uniform(kw, (E,), dtype=jnp.float32)

    # deterministic parameter init (glorot-ish weights, zero biases as in PyG)
    W1 = jax.random.normal(kw1, (F_IN, HID), dtype=jnp.float32) * np.sqrt(2.0 / (F_IN + HID))
    b1 = jnp.zeros((1, HID), jnp.float32)
    W2 = jax.random.normal(kw2, (HID, NUM_CLUSTER), dtype=jnp.float32) * np.sqrt(2.0 / (HID + NUM_CLUSTER))
    b2 = jnp.zeros((1, NUM_CLUSTER), jnp.float32)

    fx, total_loss = gcn_edge2cluster(X, edge_index, edge_attr, W1, b1, W2, b2)
    jax.block_until_ready((fx, total_loss))

    fx_ref, loss_ref_val = reference(X, edge_index, edge_attr, W1, b1, W2, b2)
    # bf16 MXU matmuls on A => loosened tolerances vs the f32 reference.
    assert np.allclose(np.asarray(fx), np.asarray(fx_ref), atol=5e-3, rtol=1e-2), \
        float(np.max(np.abs(np.asarray(fx) - np.asarray(fx_ref))))
    assert np.allclose(np.asarray(total_loss), np.asarray(loss_ref_val), atol=1e-2, rtol=2e-2), \
        (float(total_loss), float(loss_ref_val))

    print("KERNEL_OK")
</pallas_src>

<mosaic_0001>
module attributes {stable_mosaic.version = 11 : i64} {
  func.func @_conv1_kernel(%arg0: i32, %arg1: memref<16x48xbf16, #tpu.memory_space<vmem>>, %arg2: memref<48x8xf32, #tpu.memory_space<vmem>>, %arg3: memref<8x128xf32, #tpu.memory_space<vmem>>, %arg4: memref<1x128xf32, #tpu.memory_space<vmem>>, %arg5: memref<128x128xf32, #tpu.memory_space<vmem>>, %arg6: memref<16x128xbf16, #tpu.memory_space<vmem>>) attributes {dimension_semantics = [#tpu.dimension_semantics<parallel>], iteration_bounds = array<i64: 3>, scalar_prefetch = 0 : i64, scratch_operands = 0 : i64, tpu.core_type = #tpu.core_type<tc>, window_params = [{transform_indices = @transform_0, window_bounds = array<i64: 16, 48>}, {pipeline_mode = #tpu.pipeline_mode<synchronous>, transform_indices = @transform_1, window_bounds = array<i64: 48, 8>}, {pipeline_mode = #tpu.pipeline_mode<synchronous>, transform_indices = @transform_2, window_bounds = array<i64: 8, 128>}, {pipeline_mode = #tpu.pipeline_mode<synchronous>, transform_indices = @transform_3, window_bounds = array<i64: 1, 128>}, {pipeline_mode = #tpu.pipeline_mode<synchronous>, transform_indices = @transform_4, window_bounds = array<i64: 128, 128>}, {transform_indices = @transform_5, window_bounds = array<i64: 16, 128>}]} {
    %c0 = arith.constant 0 : index
    %c0_0 = arith.constant 0 : index
    %0 = vector.load %arg2[%c0, %c0_0] : memref<48x8xf32, #tpu.memory_space<vmem>>, vector<48x8xf32>
    %c0_1 = arith.constant 0 : index
    %c0_2 = arith.constant 0 : index
    %1 = vector.load %arg3[%c0_1, %c0_2] : memref<8x128xf32, #tpu.memory_space<vmem>>, vector<8x128xf32>
    %cst = arith.constant dense<0.000000e+00> : vector<48x128xf32>
    %2 = tpu.matmul %0, %1, %cst {dimension_numbers = #tpu.dot_dimension_numbers<[1], [0], [0], [1], [0, 0, 1, 1], [], []>} : vector<48x8xf32>, vector<8x128xf32>, vector<48x128xf32> -> vector<48x128xf32>
    %c0_3 = arith.constant 0 : index
    %c0_4 = arith.constant 0 : index
    %3 = vector.load %arg1[%c0_3, %c0_4] : memref<16x48xbf16, #tpu.memory_space<vmem>>, vector<16x48xbf16>
    %4 = arith.truncf %2 : vector<48x128xf32> to vector<48x128xbf16>
    %cst_5 = arith.constant dense<0.000000e+00> : vector<16x128xf32>
    %5 = tpu.matmul %3, %4, %cst_5 {dimension_numbers = #tpu.dot_dimension_numbers<[1], [0], [0], [1], [0, 0, 1, 1], [], []>} : vector<16x48xbf16>, vector<48x128xbf16>, vector<16x128xf32> -> vector<16x128xf32>
    %c0_6 = arith.constant 0 : index
    %c0_7 = arith.constant 0 : index
    %6 = vector.load %arg4[%c0_6, %c0_7] : memref<1x128xf32, #tpu.memory_space<vmem>>, vector<1x128xf32>
    %7 = vector.broadcast %6 : vector<1x128xf32> to vector<16x128xf32>
    %8 = arith.addf %5, %7 : vector<16x128xf32>
    %cst_8 = arith.constant 0.000000e+00 : f32
    %9 = vector.broadcast %cst_8 : f32 to vector<16x128xf32>
    %10 = arith.maximumf %8, %9 : vector<16x128xf32>
    %c0_9 = arith.constant 0 : index
    %c0_10 = arith.constant 0 : index
    %11 = vector.load %arg5[%c0_9, %c0_10] : memref<128x128xf32, #tpu.memory_space<vmem>>, vector<128x128xf32>
    %cst_11 = arith.constant dense<0.000000e+00> : vector<16x128xf32>
    %12 = tpu.matmul %10, %11, %cst_11 {dimension_numbers = #tpu.dot_dimension_numbers<[1], [0], [0], [1], [0, 0, 1, 1], [], []>} : vector<16x128xf32>, vector<128x128xf32>, vector<16x128xf32> -> vector<16x128xf32>
    %13 = arith.truncf %12 : vector<16x128xf32> to vector<16x128xbf16>
    %c0_12 = arith.constant 0 : index
    %c0_13 = arith.constant 0 : index
    %14 = vector.load %arg6[%c0_12, %c0_13] : memref<16x128xbf16, #tpu.memory_space<vmem>>, vector<16x128xbf16>
    tpu.vector_store %arg6[%c0_12, %c0_13], %13 {strides = array<i32>} : memref<16x128xbf16, #tpu.memory_space<vmem>>, vector<16x128xbf16>,
    return
  }
  func.func @transform_0(%arg0: i32) -> (i32, i32) {
    %c0_i32 = arith.constant 0 : i32
    %c0_i32_0 = arith.constant 0 : i32
    return %arg0, %c0_i32 : i32, i32
  }
  func.func @transform_1(%arg0: i32) -> (i32, i32) {
    %c0_i32 = arith.constant 0 : i32
    %c0_i32_0 = arith.constant 0 : i32
    %c0_i32_1 = arith.constant 0 : i32
    return %c0_i32, %c0_i32_0 : i32, i32
  }
  func.func @transform_2(%arg0: i32) -> (i32, i32) {
    %c0_i32 = arith.constant 0 : i32
    %c0_i32_0 = arith.constant 0 : i32
    %c0_i32_1 = arith.constant 0 : i32
    return %c0_i32, %c0_i32_0 : i32, i32
  }
  func.func @transform_3(%arg0: i32) -> (i32, i32) {
    %c0_i32 = arith.constant 0 : i32
    %c0_i32_0 = arith.constant 0 : i32
    %c0_i32_1 = arith.constant 0 : i32
    return %c0_i32, %c0_i32_0 : i32, i32
  }
  func.func @transform_4(%arg0: i32) -> (i32, i32) {
    %c0_i32 = arith.constant 0 : i32
    %c0_i32_0 = arith.constant 0 : i32
    %c0_i32_1 = arith.constant 0 : i32
    return %c0_i32, %c0_i32_0 : i32, i32
  }
  func.func @transform_5(%arg0: i32) -> (i32, i32) {
    %c0_i32 = arith.constant 0 : i32
    %c0_i32_0 = arith.constant 0 : i32
    return %arg0, %c0_i32 : i32, i32
  }
}

</mosaic_0001>

<bundles_post_ra>
// kernel: tpu_custom_call.1
= control target key start
LH: loop header
LB: loop body
LE: loop exit
PB: predicated region body
PF: predicated region fallthrough
CT: control target
= control target key end

     0   :  { %10 = vsyncpa [#allocation3], 0  ;;  %s827_s0 = inlined_call_operand.vmem [shape: bf16[48,48], index: 0, kind: input, shape index: {}]   ;;  %s828_s1 = inlined_call_operand.vmem [shape: f32[48,8], index: 1, kind: input, shape index: {}]   ;;  %s829_s2 = inlined_call_operand.vmem [shape: f32[8,128], index: 2, kind: input, shape index: {}]   ;;  %s830_s3 = inlined_call_operand.vmem [shape: f32[1,128], index: 3, kind: input, shape index: {}]   ;;  %s831_s4 = inlined_call_operand.hbm [shape: f32[128,128], index: 4, kind: input, shape index: {}]   ;;  %s832_s5 = inlined_call_operand.hbm [shape: bf16[48,128], index: 5, kind: output, shape index: {}]  }
   0x1   :  { %11 = vsyncpa [#allocation4], 0 }
   0x2   :  { %13 = vsyncpa [#allocation4 + $0x1], 0  ;;  %s709_s18 = smov 0   ;;  %s711_s19 = smov 0  }
   0x3   :  { %s713_s20 = smov 0   ;;  %s715_s21 = smov 0  }
   0x4 LB: > { %s730_s22 = sadd.s32 4294967295, %s672_s21   ;;  %s472_s23 = sadd.s32 4294967294, %s672_s21   ;;  %s672_s21 = sphi %s715_s21, %s838_s21   ;;  %s668_s20 = sphi %s713_s20, %s837_s20   ;;  %s664_s19 = sphi %s711_s19, %s836_s19   ;;  %s660_s18 = sphi %s709_s18, %s835_s18  }
   0x5   : > { %s734_s24 = sadd.s32 1, %s672_s21   ;;  %s136_s25 = sadd.s32 1, %s668_s20 }
   0x6   : > { %s133_s26 = ssub.s32 %s672_s21, %s734_s24  ;;  %p146_p0 = scmp.ne.s32.totalorder %s668_s20, %s664_s19 }
   0x7   : > { %p134_p1 = scmp.eq.s32.totalorder %s133_s26, 0  ;;  %p147_p2 = scmp.eq.s32.totalorder %s730_s22, 2 }
   0x8   : > { %p152_p3 = scmp.ne.s32.totalorder %s664_s19, %s660_s18  ;;  %p153_p4 = scmp.eq.s32.totalorder %s472_s23, 2 }
   0x9   : > { %s745_s27 = scalar_select %p134_p1, %s668_s20, %s136_s25  }
   0xa   : > { %p747_p5 = por %p147_p2, %p146_p0  ;;  %p751_p6 = por %p153_p4, %p152_p3 }
   0xb   : > { %p473_p7 = scmp.ge.s32.totalorder %s672_s21, 1  ;;  %p160_p8 = scmp.lt.s32.totalorder %s672_s21, 4 }
   0xc   : > { %p535_p9 = scmp.eq.s32.totalorder %s730_s22, 0  ;;  %s180_s7 = sshll.u32 %s831_s4, 4  ;;  %s181_s7 = int_to_ptr.hbm [resolvable:$true] %s180_s7 }
   0xd   : > { %p161_p10 = pnand %p473_p7, %p160_p8  ;;  %s674_s8 = smov [#allocation2]  }
   0xe   : > { %s182_s9 = sshll.u32 %s674_s8, 4  ;;  %s675_s10 = smov 128   ;;  %s183_s9 = int_to_ptr.vmem [resolvable:$true] %s182_s9 }
   0xf   : > { %p527_p11 = pneg %p161_p10  ;;  %s676_s11 = smov 8  }
  0x10   : > { %207 = sbr.rel (%p161_p10) target bundleno = 459 (0x1cb), region = 40 }
  0x11   : > { %p528_p12 = pnand %p535_p9, %p527_p11 }
  0x13   : > { %530 = dma.hbm_to_vmem [thread:$0]  (!%p528_p12), %s181_s7, 2048, %s183_s9, [#allocation3], %s675_s10, %s675_s10, %s676_s11  }
  0x15   : > { %651 = dma.done.wait (%p535_p9), [#allocation3], 2048  }
  0x16   : > { %653 = vsyncadd (%p535_p9), [#allocation3], 4294965248  ;;  %vm251_vm0 = vcmask 64512   ;;  %v250_v0 = vld [vmem:[%s829_s2] sm:$0xff]  ;;  %v245_v3 = vld [vmem:[%s828_s1 + $0x8] sm:$0xff]  ;;  %s479_s10 = sshll.u32 %s730_s22, 1 }
  0x17   : > { %v244_v1 = vld [vmem:[%s828_s1] sm:$0xff]  ;;  %285 = vmatpush.msra.mxu0 %v250_v0  ;;  %504 = vmatpush.msra.mxu1 %v250_v0  ;;  %v249_v4 = vld [vmem:[%s828_s1 + $0x28] sm:$0xff]  ;;  %v246_v5 = vld [vmem:[%s828_s1 + $0x10] sm:$0xff]  ;;  %p237_p13 = scmp.lt.s32.totalorder %s479_s10, 5  ;;  %vm319_vm1 = vcmask 392192   ;;  %s233_s17 = sand.u32 1, %s664_s19  }
  0x18   : > { %v248_v2 = vld [vmem:[%s828_s1 + $0x20] sm:$0xff]  ;;  %481 = vmatmul.msk.f32.vlgmr.msra.gmra.mxu0 %vm251_vm0, %v244_v1  ;;  %v247_v6 = vld [vmem:[%s828_s1 + $0x18] sm:$0xff]  ;;  %v353_v10 = vld [vmem:[#allocation2 + $0x70] sm:$0xff]  ;;  %s478_s23 = sshll.u32 %s233_s17, 3  ;;  %s498_s25 = sshll.u32 %s730_s22, 3 }
  0x19   : > { %485 = vmatmul.msk.f32.vlgmr.msra.gmra.mxu1 %vm251_vm0, %v248_v2  ;;  %v354_v9 = vld [vmem:[#allocation2 + $0x78] sm:$0xff]  ;;  %v352_v11 = vld [vmem:[#allocation2 + $0x68] sm:$0xff]  ;;  %v351_v12 = vld [vmem:[#allocation2 + $0x60] sm:$0xff]  ;;  %s840_s10 = smov (!%p237_p13, %s479_s10), 5  ;;  %s394_s6 = scalar_lea.hbm %s832_s5, %s498_s25 }
  0x1a   : > { %355 = vmatpush.msra.mxu2 %v354_v9  ;;  %505 = vmatpush.msra.mxu3 %v354_v9  ;;  %v350_v15 = vld [vmem:[#allocation2 + $0x58] sm:$0xff]  ;;  %v349_v17 = vld [vmem:[#allocation2 + $0x50] sm:$0xff]  ;;  %v348_v18 = vld [vmem:[#allocation2 + $0x48] sm:$0xff]  ;;  %s480_s11 = sshll.u32 %s840_s10, 2  ;;  %s235_s7 = scalar_lea.vmem [#allocation5], %s478_s23 }
  0x1b   : > { %v347_v19 = vld [vmem:[#allocation2 + $0x40] sm:$0xff]  ;;  %v346_v21 = vld [vmem:[#allocation2 + $0x38] sm:$0xff]  ;;  %v345_v22 = vld [vmem:[#allocation2 + $0x30] sm:$0xff]  ;;  %s240_s14 = scalar_lea.vmem %s827_s0, %s480_s11  ;;  %s395_s8 = sshll.u32 %s235_s7, 4  ;;  %s396_s8 = int_to_ptr.vmem [resolvable:$true] %s395_s8 }
  0x1c   : > { %356 = vmatpush.msra.mxu2 %v353_v10  ;;  %506 = vmatpush.msra.mxu3 %v353_v10  ;;  %v344_v23 = vld [vmem:[#allocation2 + $0x28] sm:$0xff]  ;;  %v343_v24 = vld [vmem:[#allocation2 + $0x20] sm:$0xff]  ;;  %v342_v29 = vld [vmem:[#allocation2 + $0x18] sm:$0xff]  ;;  %s397_s9 = sshll.u32 %s394_s6, 4  ;;  %s383_s10 = scalar_lea.sflag [#allocation4], %s233_s17  ;;  %s398_s9 = int_to_ptr.hbm [resolvable:$true] %s397_s9 }
  0x1d   : > { %v497_v28 = vld [vmem:[%s240_s14] sm:$0xff]  ;;  %v341_v30 = vld [vmem:[#allocation2 + $0x10] sm:$0xff]  ;;  %v340_v31 = vld [vmem:[#allocation2 + $0x8] sm:$0xff]  ;;  %s620_s11 = sshra.s32 %s398_s9, 4  ;;  %s626_s14 = scalar_lea.hbm %s832_s5, 24  ;;  %s621_s11 = int_to_ptr.hbm [resolvable:$true] %s620_s11 }
  0x1e   : > { %357 = vmatpush.msra.mxu2 %v352_v11  ;;  %507 = vmatpush.msra.mxu3 %v352_v11  ;;  %v339_v32 = vld [vmem:[#allocation2] sm:$0xff]  ;;  %s622_s12 = scalar_lea.hbm %s621_s11, 8  ;;  %p627_p3 = scmp.lt.s32.totalorder %s621_s11, %s832_s5 }
  0x1f   : > { %v575_v33 = vld [vmem:[%s830_s3] ss:$0 sm:$0xff]  ;;  %p623_p0 = scmp.ne.s32.totalorder %s621_s11, %s622_s12  ;;  %p628_p4 = scmp.lt.s32.totalorder %s626_s14, %s622_s12 }
  0x20   : > { %482 = vmatmul.msk.f32.gmra.mxu0 %vm251_vm0, %v245_v3  ;;  %358 = vmatpush.msra.mxu2 %v351_v12 }
  0x21   : > { %486 = vmatmul.msk.f32.gmra.mxu1 %vm251_vm0, %v249_v4  ;;  %508 = vmatpush.msra.mxu3 %v351_v12  ;;  %p624_p1 = pnand %p623_p0, %p747_p5  ;;  %p629_p7 = por %p628_p4, %p627_p3 }
  0x22   : > { %359 = vmatpush.msra.mxu2 %v350_v15 }
  0x23   : > { %509 = vmatpush.msra.mxu3 %v350_v15  ;;  %p625_p2 = pneg %p624_p1 }
  0x24   : > { %360 = vmatpush.msra.mxu2 %v349_v17 }
  0x25   : > { %510 = vmatpush.msra.mxu3 %v349_v17  ;;  %p630_p8 = pnand %p629_p7, %p625_p2 }
  0x26   : > { %361 = vmatpush.msra.mxu2 %v348_v18 }
  0x27   : > { %511 = vmatpush.msra.mxu3 %v348_v18 }
  0x28   : > { %483 = vmatmul.msk.f32.gmra.mxu0 %vm251_vm0, %v246_v5  ;;  %362 = vmatpush.msra.mxu2 %v347_v19 }
  0x29   : > { %512 = vmatpush.msra.mxu3 %v347_v19 }
  0x2a   : > { %363 = vmatpush.msra.mxu2 %v346_v21 }
  0x2b   : > { %513 = vmatpush.msra.mxu3 %v346_v21 }
  0x2c   : > { %364 = vmatpush.msra.mxu2 %v345_v22 }
  0x2d   : > { %514 = vmatpush.msra.mxu3 %v345_v22 }
  0x2e   : > { %365 = vmatpush.msra.mxu2 %v344_v23 }
  0x2f   : > { %515 = vmatpush.msra.mxu3 %v344_v23 }
  0x30   : > { %484 = vmatmul.msk.f32.gmra.mxu0 %vm251_vm0, %v247_v6  ;;  %366 = vmatpush.msra.mxu2 %v343_v24 }
  0x31   : > { %516 = vmatpush.msra.mxu3 %v343_v24 }
  0x32   : > { %367 = vmatpush.msra.mxu2 %v342_v29 }
  0x33   : > { %517 = vmatpush.msra.mxu3 %v342_v29 }
  0x34   : > { %368 = vmatpush.msra.mxu2 %v341_v30 }
  0x35   : > { %518 = vmatpush.msra.mxu3 %v341_v30 }
  0x36   : > { %369 = vmatpush.msra.mxu2 %v340_v31 }
  0x37   : > { %519 = vmatpush.msra.mxu3 %v340_v31 }
  0x38   : > { %370 = vmatpush.msra.mxu2 %v339_v32 }
  0x39   : > { %520 = vmatpush.msra.mxu3 %v339_v32 }
  0x95   : > { %v287_v7 = vpop.f32.mrf.mxu0 }
  0x96   : > { %v299_v8 = vpop.f32.mrf.mxu1 }
  0x9d   : > { %v290_v13 = vpop.f32.mrf.mxu0 }
  0x9e   : > { %v302_v14 = vpop.f32.mrf.mxu1  ;;  %v307_v27 = vpack.c.bf16 %v290_v13, %v287_v7 }
  0x9f   : > { %v309_v16 = vpack.c.bf16 %v302_v14, %v299_v8 }
  0xa1   : > { %328 = vmatpush.bf16.msrb.mxu1 %v309_v16 }
  0xa5   : > { %v293_v20 = vpop.f32.mrf.mxu0 }
  0xad   : > { %v296_v25 = vpop.f32.mrf.mxu0 }
  0xae   : > { %v308_v26 = vpack.c.bf16 %v296_v25, %v293_v20 }
  0xb0   : > { %329 = vmatpush.bf16.msrb.mxu1 %v308_v26 }
  0xb4   : > { %330 = vmatpush.bf16.msrb.mxu1 %v307_v27 }
  0xb7   : > { %491 = vmatmul.msk.bf16.vlgmr.msrb.gmra.mxu1 %vm319_vm1, %v497_v28 }
 0x134   : > { %v332_v34 = vpop.f32.mrf.mxu1 }
 0x135   : > { %v333_v35 = vadd.f32 %v575_v33, %v332_v34 }
 0x137   : > { %v337_v36 = vmax.f32 %v333_v35, 0.0 }
 0x139   : > { %371 = vmatmul.f32.vlgmr.msra.gmra.mxu2 %v337_v36 }
 0x13c   : > { %v334_v37 = vpop.f32.mrf.mxu1 }
 0x13d   : > { %v335_v38 = vadd.f32 %v575_v33, %v334_v37 }
 0x13f   : > { %v338_v39 = vmax.f32 %v335_v38, 0.0 }
 0x141   : > { %374 = vmatmul.f32.vlgmr.msra.gmra.mxu3 %v338_v39 }
 0x1bc   : > { %v372_v40 = vpop.f32.mrf.mxu2 }
 0x1c4   : > { %v375_v41 = vpop.f32.mrf.mxu3 }
 0x1c5   : > { %v502_v42 = vpack.c.bf16 %v375_v41, %v372_v40 }
 0x1c7   : > { %503 = vst [vmem:[%s235_s7] sm:$0xff] %v502_v42  }
 0x1c8   : > { %633 = shalt.err (!%p630_p8)
}
 0x1c9   : > { %s677_s17 = smov 64   ;;  %s678_s23 = smov 4  }
 0x1ca   : > { %525 = dma.vmem_to_hbm [thread:$0]  (%p747_p5), %s396_s8, 128, %s398_s9, %s383_s10, %s677_s17, %s677_s17, %s678_s23  }
 0x1cb PF: > { %p537_p9 = scmp.ge.s32.totalorder %s672_s21, 2  ;;  %s412_s25 = sand.u32 1, %s660_s18  }
 0x1cc   : > { %s413_s26 = scalar_lea.sflag [#allocation4], %s412_s25 }
 0x1cd   : > { %p532_p10 = pnand %p537_p9, %p751_p6 }
 0x1cf   : > { %p533_p11 = pneg %p532_p10 }
 0x1d1   : > { %655 = dma.done.wait (%p533_p11), %s413_s26, 128  }
 0x1d2   : > { %657 = vsyncadd (%p533_p11), %s413_s26, 4294967168  ;;  %p16_p12 = scmp.ge.s32.totalorder %s734_s24, 5   ;;  %s835_s18 = smov %s664_s19 }
 0x1d3   : > { %s836_s19 = smov %s668_s20  ;;  %s837_s20 = smov %s745_s27 }
 0x1d4   : > { %s838_s21 = smov %s734_s24  ;;  %18 = sbr.rel (!%p16_p12) target bundleno = 4 (0x4), region = 80 }
 0x1d9   :  { %419 = vsyncpa [#allocation3], 1 }
 0x1da   :  { %421 = vsyncpa [#allocation3 + $0x1], 1 }
 0x1db   :  { %422 = vsyncpa [#allocation4], 1 }
 0x1dc   :  { %424 = vsyncpa [#allocation4 + $0x1], 1 }

</bundles_post_ra>
